<compile_context>
chip_gen: v5e
topology: v5e:2x2
jax: 0.10.0
libtpu: 0.0.40
codegen_flags: <defaults>
</compile_context>

<pallas_src>
import functools
import random

import numpy as np
import jax
import jax.numpy as jnp
from jax.experimental import pallas as pl
from jax.experimental.pallas import tpu as pltpu

_MiB = 1 << 20


def _round_up(x, m):
    return ((x + m - 1) // m) * m


# ----------------------------- Pallas kernels --------------------------------
def _mean_agg_kernel_resident(mask_ref, embed_ref, out_ref, *, d_col):
    """Whole embed matrix resident in VMEM; one dot per B tile, no reduction axis."""
    m = mask_ref[...].astype(jnp.bfloat16)                      # int8 0/1 -> bf16
    acc = jnp.dot(m, embed_ref[...], preferred_element_type=jnp.float32)
    cnt = jnp.maximum(acc[:, d_col:d_col + 1], 1.0)             # count via ones-column
    out_ref[...] = acc / cnt                                    # exact, once per tile


def _mean_agg_kernel_reduce(mask_ref, embed_ref, out_ref, *, d_col):
    """U is a grid reduction axis; the f32 output block doubles as the accumulator."""
    k = pl.program_id(1)

    @pl.when(k == 0)
    def _():
        out_ref[...] = jnp.zeros_like(out_ref)

    m = mask_ref[...].astype(jnp.bfloat16)
    out_ref[...] += jnp.dot(m, embed_ref[...], preferred_element_type=jnp.float32)

    @pl.when(k == pl.num_programs(1) - 1)
    def _():
        acc = out_ref[...]
        cnt = jnp.maximum(acc[:, d_col:d_col + 1], 1.0)
        out_ref[...] = acc / cnt


# ------------------------------- host wrapper --------------------------------
def mean_aggregate(mask, embed_matrix, *, block_b=256, block_u=2048,
                   resident_budget_bytes=28 * _MiB):
    """(mask / clamp(mask.sum(1, keepdims=True), 1)) @ embed_matrix  ->  float32."""
    B, U = mask.shape
    U2, D = embed_matrix.shape
    assert U == U2

    mask = mask.astype(jnp.int8)                   # 0/1 exact; halves mask HBM bytes
    embed_matrix = embed_matrix.astype(jnp.bfloat16)

    # Reserve one extra (padding) column, index D, that is all ones so the MXU
    # produces the per-row neighbor count as a free extra output column.
    d_col = D
    D_pad = _round_up(D + 1, 128)

    # B tiling: multiples of 32 (int8 sublane packing). Default tile 256 fills the
    # 256-wide MXU on v6e/v7x; split in two if the B grid would be a single block
    # so both v7x TensorCores get work.
    B32 = _round_up(B, 32)
    tB = min(block_b, B32)
    if B32 // tB < 2 and B32 >= 64:
        tB = _round_up(-(-B32 // 2), 32)
    B_pad = _round_up(B32, tB)

    U_pad = _round_up(U, 128)

    # Working-set estimate for the resident-embed path (double-buffered windows +
    # the bf16 mask upcast temp + an f32 result temp).
    out_bytes = 2 * tB * D_pad * 4 + tB * D_pad * 4
    resident_need = (2 * tB * U_pad             # int8 mask window (x2 buffers)
                     + tB * U_pad * 2           # bf16 upcast temp
                     + 2 * U_pad * D_pad * 2    # embed window (x2 buffers)
                     + out_bytes)
    use_resident = resident_need <= resident_budget_bytes

    if use_resident:
        grid = (B_pad // tB,)
        in_specs = [pl.BlockSpec((tB, U_pad), lambda i: (i, 0)),
                    pl.BlockSpec((U_pad, D_pad), lambda i: (0, 0))]   # DMA'd once
        out_specs = pl.BlockSpec((tB, D_pad), lambda i: (i, 0))
        kernel = functools.partial(_mean_agg_kernel_resident, d_col=d_col)
        dim_sem = ("parallel",)
        need = resident_need
    else:
        # Large tiles over the reduction dim amortize the ~0.35us/step overhead,
        # but keep the embed window <= ~8 MiB per buffer for very wide D.
        embed_row_budget = max(128, ((8 * _MiB) // (D_pad * 2)) // 128 * 128)
        tU = min(block_u, U_pad, embed_row_budget)
        U_pad = _round_up(U, tU)
        grid = (B_pad // tB, U_pad // tU)
        in_specs = [pl.BlockSpec((tB, tU), lambda i, k: (i, k)),
                    pl.BlockSpec((tU, D_pad), lambda i, k: (k, 0))]
        out_specs = pl.BlockSpec((tB, D_pad), lambda i, k: (i, 0))
        kernel = functools.partial(_mean_agg_kernel_reduce, d_col=d_col)
        dim_sem = ("parallel", "arbitrary")
        need = 2 * tB * tU + tB * tU * 2 + 2 * tU * D_pad * 2 + out_bytes

    # Pad operands; the ones-column carries the per-row neighbor count.
    if (B_pad, U_pad) != (B, U):
        mask = jnp.pad(mask, ((0, B_pad - B), (0, U_pad - U)))
    embed_p = jnp.pad(embed_matrix, ((0, U_pad - U), (0, D_pad - D)))
    embed_p = embed_p.at[:, d_col].set(1.0)

    # Real requirement + headroom, capped below v7x physical VMEM (64 MiB / TC).
    vmem_limit = int(min(48 * _MiB, max(32 * _MiB, need + 8 * _MiB)))

    out = pl.pallas_call(
        kernel,
        out_shape=jax.ShapeDtypeStruct((B_pad, D_pad), jnp.float32),
        grid_spec=pltpu.PrefetchScalarGridSpec(
            num_scalar_prefetch=0,
            grid=grid,
            in_specs=in_specs,
            out_specs=out_specs,
        ),
        compiler_params=pltpu.CompilerParams(
            dimension_semantics=dim_sem,
            vmem_limit_bytes=vmem_limit,
        ),
    )(mask, embed_p)
    return out[:B, :D]


# --------------------------- module-equivalent glue --------------------------
class MeanAggregatorPallas:
    """Aggregates a node's embeddings using the mean of its neighbors' embeddings."""

    def __init__(self, features, gcn=False):
        # features: function mapping an int64 numpy array of node ids to an
        #           [n, feat_dim] feature matrix (like the torch `features` fn).
        self.features = features
        self.gcn = gcn

    def forward(self, nodes, to_neighs, num_sample=10):
        _set = set
        if num_sample is not None:
            _sample = random.sample
            samp_neighs = [
                _set(_sample(sorted(to_neigh), num_sample))
                if len(to_neigh) >= num_sample else to_neigh
                for to_neigh in to_neighs
            ]
        else:
            samp_neighs = to_neighs
        if self.gcn:
            samp_neighs = [
                samp_neigh.union({int(nodes[i])})
                for i, samp_neigh in enumerate(samp_neighs)
            ]
        unique_nodes_list = list(set.union(*samp_neighs))
        unique_nodes = {n: i for i, n in enumerate(unique_nodes_list)}
        B = len(samp_neighs)
        U = len(unique_nodes_list)

        # Dense 0/1 membership mask, built host-side as int8 (half the bytes of f32).
        # TODO(synk): replace with a scalar-prefetch gather kernel for sparse/large-U.
        col = [unique_nodes[n] for s in samp_neighs for n in s]
        row = [i for i in range(B) for _ in samp_neighs[i]]
        mask = np.zeros((B, U), dtype=np.int8)
        mask[row, col] = 1

        embed = jnp.asarray(self.features(np.asarray(unique_nodes_list, np.int64)))
        return mean_aggregate(jnp.asarray(mask), embed)       # [B, D] float32


# ------------------------------------ main -----------------------------------
if __name__ == "__main__":
    random.seed(0)
    np.random.seed(0)

    num_nodes = 64     # total graph nodes
    feat_dim = 32      # embedding dimension
    batch = 8          # nodes in the batch
    num_sample = 10

    # Deterministic "features" lookup table (stand-in for nn.Embedding weights),
    # stored in bf16 so the features fn feeds MXU-native operands directly.
    key = jax.random.PRNGKey(0)
    table_bf16 = jax.random.normal(key, (num_nodes, feat_dim),
                                   dtype=jnp.float32).astype(jnp.bfloat16)
    table_f32 = np.asarray(table_bf16.astype(jnp.float32))

    def features_fn(node_ids):
        return table_bf16[jnp.asarray(np.asarray(node_ids))]

    # Deterministic synthetic graph: degrees 3..9 (< num_sample, so no random
    # sampling happens and the numpy reference matches exactly what forward sees).
    nodes = list(range(batch))
    to_neighs = []
    for i in range(batch):
        deg = 3 + (i * 5) % 7
        neighs = {(i * 7 + 3 * j + 1) % num_nodes for j in range(deg)}
        neighs.discard(i)
        if not neighs:
            neighs = {(i + 1) % num_nodes}
        to_neighs.append(neighs)

    agg = MeanAggregatorPallas(features_fn, gcn=False)
    out = agg.forward(nodes, to_neighs, num_sample=num_sample)
    out = jax.block_until_ready(out)

    # Pure-numpy reference: mean of (bf16-rounded) neighbor features in f32.
    ref = np.stack([table_f32[sorted(s)].mean(axis=0) for s in to_neighs])

    assert out.shape == (batch, feat_dim)
    np.testing.assert_allclose(np.asarray(out, dtype=np.float32), ref,
                               rtol=1e-4, atol=1e-5)   # exact divide -> tight tol

    print("KERNEL_OK")
</pallas_src>

<mosaic_0001>
module attributes {stable_mosaic.version = 11 : i64} {
  func.func @_mean_agg_kernel_resident(%arg0: i32, %arg1: memref<32x128xi8, #tpu.memory_space<vmem>>, %arg2: memref<128x128xbf16, #tpu.memory_space<vmem>>, %arg3: memref<32x128xf32, #tpu.memory_space<vmem>>) attributes {dimension_semantics = [#tpu.dimension_semantics<parallel>], iteration_bounds = array<i64: 1>, scalar_prefetch = 0 : i64, scratch_operands = 0 : i64, tpu.core_type = #tpu.core_type<tc>, window_params = [{transform_indices = @transform_0, window_bounds = array<i64: 32, 128>}, {pipeline_mode = #tpu.pipeline_mode<synchronous>, transform_indices = @transform_1, window_bounds = array<i64: 128, 128>}, {transform_indices = @transform_2, window_bounds = array<i64: 32, 128>}]} {
    %c0 = arith.constant 0 : index
    %c0_0 = arith.constant 0 : index
    %0 = vector.load %arg1[%c0, %c0_0] : memref<32x128xi8, #tpu.memory_space<vmem>>, vector<32x128xi8>
    %1 = arith.sitofp %0 : vector<32x128xi8> to vector<32x128xbf16>
    %c0_1 = arith.constant 0 : index
    %c0_2 = arith.constant 0 : index
    %2 = vector.load %arg2[%c0_1, %c0_2] : memref<128x128xbf16, #tpu.memory_space<vmem>>, vector<128x128xbf16>
    %cst = arith.constant dense<0.000000e+00> : vector<32x128xf32>
    %3 = tpu.matmul %1, %2, %cst {dimension_numbers = #tpu.dot_dimension_numbers<[1], [0], [0], [1], [0, 0, 1, 1], [], []>} : vector<32x128xbf16>, vector<128x128xbf16>, vector<32x128xf32> -> vector<32x128xf32>
    %4 = vector.extract_strided_slice %3 {offsets = [0, 32], sizes = [32, 1], strides = [1, 1]} : vector<32x128xf32> to vector<32x1xf32>
    %cst_3 = arith.constant 1.000000e+00 : f32
    %5 = vector.broadcast %cst_3 : f32 to vector<32x1xf32>
    %6 = arith.maximumf %4, %5 : vector<32x1xf32>
    %7 = vector.broadcast %6 : vector<32x1xf32> to vector<32x128xf32>
    %8 = arith.divf %3, %7 : vector<32x128xf32>
    %c0_4 = arith.constant 0 : index
    %c0_5 = arith.constant 0 : index
    %9 = vector.load %arg3[%c0_4, %c0_5] : memref<32x128xf32, #tpu.memory_space<vmem>>, vector<32x128xf32>
    tpu.vector_store %arg3[%c0_4, %c0_5], %8 {strides = array<i32>} : memref<32x128xf32, #tpu.memory_space<vmem>>, vector<32x128xf32>,
    return
  }
  func.func @transform_0(%arg0: i32) -> (i32, i32) {
    %c0_i32 = arith.constant 0 : i32
    %c0_i32_0 = arith.constant 0 : i32
    return %arg0, %c0_i32 : i32, i32
  }
  func.func @transform_1(%arg0: i32) -> (i32, i32) {
    %c0_i32 = arith.constant 0 : i32
    %c0_i32_0 = arith.constant 0 : i32
    %c0_i32_1 = arith.constant 0 : i32
    return %c0_i32, %c0_i32_0 : i32, i32
  }
  func.func @transform_2(%arg0: i32) -> (i32, i32) {
    %c0_i32 = arith.constant 0 : i32
    %c0_i32_0 = arith.constant 0 : i32
    return %arg0, %c0_i32 : i32, i32
  }
}

</mosaic_0001>

<bundles_post_ra>
// kernel: tpu_custom_call.1
= control target key start
LH: loop header
LB: loop body
LE: loop exit
PB: predicated region body
PF: predicated region fallthrough
CT: control target
= control target key end

     0   :  { %7 = vsyncpa [#allocation3], 0  ;;  %s428_s0 = inlined_call_operand.hbm [shape: s8[32,128], index: 0, kind: input, shape index: {}]   ;;  %s429_s1 = inlined_call_operand.hbm [shape: bf16[128,128], index: 1, kind: input, shape index: {}]   ;;  %s430_s2 = inlined_call_operand.hbm [shape: f32[32,128], index: 2, kind: output, shape index: {}]  }
   0x1   :  { %8 = vsyncpa [#allocation6], 0 }
   0x2   :  { %9 = vsyncpa [#allocation4], 0  ;;  %s15_s11 = sshll.u32 %s428_s0, 4  ;;  %s388_s12 = smov [#allocation2]   ;;  %s16_s11 = int_to_ptr.hbm [resolvable:$true] %s15_s11 }
   0x3   :  { %s17_s13 = sshll.u32 %s388_s12, 4  ;;  %s25_s16 = sshll.u32 %s429_s1, 4  ;;  %s18_s13 = int_to_ptr.vmem [resolvable:$true] %s17_s13  ;;  %s26_s16 = int_to_ptr.hbm [resolvable:$true] %s25_s16 }
   0x4   :  { %20 = dma.hbm_to_vmem [thread:$0]  %s16_s11, 128, %s18_s13, [#allocation3]  }
   0x5   :  { %s389_s17 = smov [#allocation5]   ;;  %s390_s19 = smov 64  }
   0x6   :  { %s27_s18 = sshll.u32 %s389_s17, 4  ;;  %s391_s20 = smov 4   ;;  %s28_s18 = int_to_ptr.vmem [resolvable:$true] %s27_s18 }
   0x7   :  { %33 = dma.hbm_to_vmem [thread:$0]  %s26_s16, 1024, %s28_s18, [#allocation6], %s390_s19, %s390_s19, %s391_s20  }
   0x8   :  { %382 = dma.done.wait [#allocation3], 128  }
   0x9   :  { %383 = vsyncadd [#allocation3], 4294967168 }
   0xa   :  { %384 = dma.done.wait [#allocation6], 1024  }
   0xb   :  { %385 = vsyncadd [#allocation6], 4294966272  ;;  %v283_v0 = vld [vmem:[#allocation5 + $0x38] sm:$0xff]  ;;  %v282_v1 = vld [vmem:[#allocation5 + $0x30] sm:$0xff]  ;;  %v392_v19 = vmov 32   ;;  %s393_s0 = smov [#allocation7]  }
   0xc   :  { %117 = vmatpush.bf16.msra.mxu0 %v283_v0  ;;  %284 = vmatpush.bf16.msra.mxu1 %v283_v0  ;;  %v281_v2 = vld [vmem:[#allocation5 + $0x28] sm:$0xff]  ;;  %v280_v3 = vld [vmem:[#allocation5 + $0x20] sm:$0xff]  ;;  %v279_v4 = vld [vmem:[#allocation5 + $0x18] sm:$0xff]  ;;  %s228_s1 = sshll.u32 %s393_s0, 4  ;;  %s230_s23 = sshll.u32 %s430_s2, 4  ;;  %s229_s1 = int_to_ptr.vmem [resolvable:$true] %s228_s1  ;;  %s231_s23 = int_to_ptr.hbm [resolvable:$true] %s230_s23 }
   0xd   :  { %v278_v5 = vld [vmem:[#allocation5 + $0x10] sm:$0xff]  ;;  %v42_v6 = vld [vmem:[#allocation2] sm:$0xff]  ;;  %v277_v11 = vld [vmem:[#allocation5 + $0x8] sm:$0xff]  ;;  %301 = vset.pattern.permute.xlu1 %v392_v19  ;;  %300 = vset.pattern.permute.xlu0 %v392_v19  ;;  %s394_s24 = smov 128   ;;  %s395_s25 = smov 8  }
   0xe   :  { %v43_v7 = vunpack.c.0.s8 %v42_v6  ;;  %v44_v8 = vunpack.c.1.s8 %v42_v6  ;;  %v45_v9 = vunpack.c.2.s8 %v42_v6  ;;  %v46_v10 = vunpack.c.3.s8 %v42_v6  ;;  %v276_v16 = vld [vmem:[#allocation5] sm:$0xff] }
  0x10   :  { %118 = vmatpush.bf16.msra.mxu0 %v282_v1  ;;  %285 = vmatpush.bf16.msra.mxu1 %v282_v1  ;;  %v47_v12 = vcvt.s32.f32 %v43_v7  ;;  %v48_v13 = vcvt.s32.f32 %v44_v8  ;;  %v49_v14 = vcvt.s32.f32 %v45_v9  ;;  %v50_v15 = vcvt.s32.f32 %v46_v10 }
  0x12   :  { %v51_v17 = vpack.c.bf16 %v48_v13, %v47_v12  ;;  %v52_v18 = vpack.c.bf16 %v50_v15, %v49_v14 }
  0x14   :  { %119 = vmatpush.bf16.msra.mxu0 %v281_v2  ;;  %286 = vmatpush.bf16.msra.mxu1 %v281_v2 }
  0x18   :  { %120 = vmatpush.bf16.msra.mxu0 %v280_v3  ;;  %287 = vmatpush.bf16.msra.mxu1 %v280_v3 }
  0x1c   :  { %121 = vmatpush.bf16.msra.mxu0 %v279_v4  ;;  %288 = vmatpush.bf16.msra.mxu1 %v279_v4 }
  0x20   :  { %122 = vmatpush.bf16.msra.mxu0 %v278_v5  ;;  %289 = vmatpush.bf16.msra.mxu1 %v278_v5 }
  0x24   :  { %123 = vmatpush.bf16.msra.mxu0 %v277_v11  ;;  %290 = vmatpush.bf16.msra.mxu1 %v277_v11 }
  0x28   :  { %124 = vmatpush.bf16.msra.mxu0 %v276_v16  ;;  %291 = vmatpush.bf16.msra.mxu1 %v276_v16 }
  0x2b   :  { %125 = vmatmul.bf16.vlgmr.msra.gmra.mxu0 %v51_v17  ;;  %130 = vmatmul.bf16.vlgmr.msra.gmra.mxu1 %v52_v18 }
  0xa8   :  { %v126_v20 = vpop.f32.mrf.mxu0  ;;  %v131_v21 = vpop.f32.mrf.mxu1 }
  0xa9   :  { %v138_v22 = vmax.f32 %v131_v21, 1.0  ;;  %v136_v23 = vmax.f32 %v126_v20, 1.0 }
  0xab   :  { %152 = vperm.xlu1 %301, %v138_v22   ;;  %142 = vperm.xlu0 %300, %v136_v23  }
  0xb0   :  { %v417_v24 = vpop.f32.mrf.mxu0  ;;  %v419_v25 = vpop.f32.mrf.mxu1 }
  0xb1   :  { %v137_v26 = vmax.f32 %v417_v24, 1.0  ;;  %v139_v27 = vmax.f32 %v419_v25, 1.0 }
  0xb3   :  { %157 = vperm.xlu1 %301, %v139_v27   ;;  %147 = vperm.xlu0 %300, %v137_v26  }
 0x11d   :  { %v153_v28 = vpop.permute.xlu1 %152  ;;  %v143_v29 = vpop.permute.xlu0 %142 }
 0x11e   :  { %302 = vrcp.f32 %v153_v28  ;;  %v201_v37 = vand.u32 2147483648, %v153_v28  ;;  %v199_v40 = vand.u32 2147483647, %v153_v28  ;;  %v171_v41 = vand.u32 2147483648, %v143_v29 }
 0x11f   :  { %304 = vrcp.f32 %v143_v29  ;;  %v169_v43 = vand.u32 2147483647, %v143_v29  ;;  %vm195_vm2 = vweird.f32 %v153_v28  ;;  %vm165_vm4 = vweird.f32 %v143_v29 }
 0x120   :  { %v202_v46 = vor.u32 1.1754944e-38, %v201_v37  ;;  %vm200_vm5 = vcmp.eq.f32.partialorder %v199_v40, 8.507059e+37  ;;  %v172_v50 = vor.u32 1.1754944e-38, %v171_v41 }
 0x121   :  { %vm170_vm7 = vcmp.eq.f32.partialorder %v169_v43, 8.507059e+37 }
 0x124   :  { %v303_v30 = vpop.eup %302 }
 0x125   :  { %v305_v31 = vpop.eup %304  ;;  %v191_v32 = vmul.f32 %v303_v30, %v153_v28  ;;  %v158_v33 = vpop.permute.xlu1 %157  ;;  %vm196_vm0 = vweird.f32 %v303_v30 }
 0x126   :  { %v148_v34 = vpop.permute.xlu0 %147  ;;  %v161_v35 = vmul.f32 %v305_v31, %v143_v29  ;;  %306 = vrcp.f32 %v158_v33  ;;  %vm166_vm1 = vweird.f32 %v305_v31  ;;  %vm197_vm3 = vmor %vm195_vm2, %vm196_vm0  ;;  %v216_v59 = vand.u32 2147483648, %v158_v33 }
 0x127   :  { %v192_v36 = vsub.f32 1.0, %v191_v32  ;;  %308 = vrcp.f32 %v148_v34  ;;  %vm167_vm6 = vmor %vm165_vm4, %vm166_vm1  ;;  %v214_v62 = vand.u32 2147483647, %v158_v33  ;;  %v186_v63 = vand.u32 2147483648, %v148_v34 }
 0x128   :  { %v162_v38 = vsub.f32 1.0, %v161_v35  ;;  %v184_v1 = vand.u32 2147483647, %v148_v34  ;;  %vm210_vm10 = vweird.f32 %v158_v33  ;;  %v217_v3 = vor.u32 1.1754944e-38, %v216_v59 }
 0x129   :  { %v193_v39 = vmul.f32 %v303_v30, %v192_v36  ;;  %vm180_vm12 = vweird.f32 %v148_v34  ;;  %vm215_vm13 = vcmp.eq.f32.partialorder %v214_v62, 8.507059e+37  ;;  %v187_v6 = vor.u32 1.1754944e-38, %v186_v63 }
 0x12a   :  { %v163_v42 = vmul.f32 %v305_v31, %v162_v38  ;;  %vm185_vm15 = vcmp.eq.f32.partialorder %v184_v1, 8.507059e+37 }
 0x12b   :  { %v194_v44 = vadd.f32 %v303_v30, %v193_v39 }
 0x12c   :  { %v307_v45 = vpop.eup %306  ;;  %v164_v47 = vadd.f32 %v305_v31, %v163_v42 }
 0x12d   :  { %v309_v48 = vpop.eup %308  ;;  %v198_v49 = vsel %vm197_vm3, %v303_v30, %v194_v44  ;;  %v206_v51 = vmul.f32 %v307_v45, %v158_v33  ;;  %vm211_vm8 = vweird.f32 %v307_v45 }
 0x12e   :  { %v203_v52 = vsel %vm200_vm5, %v202_v46, %v198_v49  ;;  %v168_v53 = vsel %vm167_vm6, %v305_v31, %v164_v47  ;;  %v176_v54 = vmul.f32 %v309_v48, %v148_v34  ;;  %vm181_vm9 = vweird.f32 %v309_v48  ;;  %vm212_vm11 = vmor %vm210_vm10, %vm211_vm8 }
 0x12f   :  { %v204_v55 = vmul.f32 %v203_v52, %v131_v21  ;;  %v173_v56 = vsel %vm170_vm7, %v172_v50, %v168_v53  ;;  %v207_v57 = vsub.f32 1.0, %v206_v51  ;;  %vm182_vm14 = vmor %vm180_vm12, %vm181_vm9 }
 0x130   :  { %v174_v58 = vmul.f32 %v173_v56, %v126_v20  ;;  %v177_v60 = vsub.f32 1.0, %v176_v54 }
 0x131   :  { %222 = vst [vmem:[#allocation7 + $0x10] sm:$0xff] %v204_v55  ;;  %v208_v61 = vmul.f32 %v307_v45, %v207_v57 }
 0x132   :  { %220 = vst [vmem:[#allocation7] sm:$0xff] %v174_v58  ;;  %v178_v0 = vmul.f32 %v309_v48, %v177_v60 }
 0x133   :  { %v209_v2 = vadd.f32 %v307_v45, %v208_v61 }
 0x134   :  { %v179_v4 = vadd.f32 %v309_v48, %v178_v0 }
 0x135   :  { %v213_v5 = vsel %vm212_vm11, %v307_v45, %v209_v2 }
 0x136   :  { %v218_v7 = vsel %vm215_vm13, %v217_v3, %v213_v5  ;;  %v183_v8 = vsel %vm182_vm14, %v309_v48, %v179_v4 }
 0x137   :  { %v219_v9 = vmul.f32 %v218_v7, %v419_v25  ;;  %v188_v10 = vsel %vm185_vm15, %v187_v6, %v183_v8 }
 0x138   :  { %v189_v11 = vmul.f32 %v188_v10, %v417_v24 }
 0x139   :  { %223 = vst [vmem:[#allocation7 + $0x18] sm:$0xff] %v219_v9 }
 0x13a   :  { %221 = vst [vmem:[#allocation7 + $0x8] sm:$0xff] %v189_v11 }
 0x13b   :  { %236 = dma.vmem_to_hbm [thread:$0]  %s229_s1, 512, %s231_s23, [#allocation4], %s394_s24, %s394_s24, %s395_s25  }
 0x13c   :  { %386 = dma.done.wait [#allocation4], 512  }
 0x13d   :  { %387 = vsyncadd [#allocation4], 4294966784 }
 0x13e   :  { %241 = vsyncpa [#allocation3], 1 }
 0x13f   :  { %242 = vsyncpa [#allocation6], 1 }
 0x140   :  { %243 = vsyncpa [#allocation4], 1 }

</bundles_post_ra>
